<compile_context>
chip_gen: v5e
topology: v5e:2x2
jax: 0.10.0
libtpu: 0.0.40
codegen_flags: <defaults>
</compile_context>

<pallas_src>
import functools

import jax
import jax.numpy as jnp
from jax.experimental import pallas as pl
from jax.experimental.pallas import tpu as pltpu

LN_EPS = 1e-5  # torch.nn.LayerNorm default


def _round_up(v, m):
    return -(-v // m) * m


def _cdiv(a, b):
    return -(-a // b)


@functools.lru_cache(maxsize=None)
def _vmem_cap_bytes():
    """Generation-aware VMEM budget for the kernel's scoped allocation."""
    kind = ""
    try:
        kind = jax.devices()[0].device_kind.lower()
    except Exception:  # pragma: no cover - no device visible at trace time
        pass
    if "v7" in kind:
        return 48 * 1024 * 1024        # 64 MiB physical per TC -> leave headroom
    return 100 * 1024 * 1024           # v5e / v6e: 128 MiB physical


def _ln(h, gamma, beta):
    """LayerNorm over last dim; one-pass biased variance, clamped >= 0."""
    m = jnp.mean(h, axis=-1, keepdims=True)
    msq = jnp.mean(h * h, axis=-1, keepdims=True)
    var = jnp.maximum(msq - m * m, 0.0)
    return (h - m) * jax.lax.rsqrt(var + LN_EPS) * gamma + beta


# ----------------------------------------------------------------------------
# Kernel for config.stat = False
#   y = relu(ln3(fc3(relu(ln2(fc2(relu(ln1(fc1(|x|)))))))))
# pvh rows: [b1, g1, be1, b2, g2, be2]   (hidden-sized)
# pvc rows: [b3, g3, be3]                (class-sized, unpadded)
# ----------------------------------------------------------------------------
def mlp_kernel(x_ref, w1_ref, w2_ref, w3_ref, pvh_ref, pvc_ref, out_ref):
    x = jnp.abs(x_ref[...])

    b1, g1, be1 = pvh_ref[0:1, :], pvh_ref[1:2, :], pvh_ref[2:3, :]
    b2, g2, be2 = pvh_ref[3:4, :], pvh_ref[4:5, :], pvh_ref[5:6, :]
    b3, g3, be3 = pvc_ref[0:1, :], pvc_ref[1:2, :], pvc_ref[2:3, :]

    h = jnp.dot(x.astype(w1_ref.dtype), w1_ref[...],
                preferred_element_type=jnp.float32) + b1
    h = jnp.maximum(_ln(h, g1, be1), 0.0)

    h = jnp.dot(h.astype(w2_ref.dtype), w2_ref[...],
                preferred_element_type=jnp.float32) + b2
    h = jnp.maximum(_ln(h, g2, be2), 0.0)

    h = jnp.dot(h.astype(w3_ref.dtype), w3_ref[...],
                preferred_element_type=jnp.float32) + b3
    out_ref[...] = jnp.maximum(_ln(h, g3, be3), 0.0).astype(out_ref.dtype)


# ----------------------------------------------------------------------------
# Kernel for config.stat = True
#   h  = relu(ln2(fc2(relu(ln1(fc1(|x|))))))
#   fe = feature_tf(flow_feature)
#   y  = fc(concat([h, fe], 1)) == h @ wfc[:H] + fe @ wfc[H:] + bfc
# pvh rows: [b1, g1, be1, b2, g2, be2, btf]
# ----------------------------------------------------------------------------
def mlp_stat_kernel(ff_ref, x_ref, w1_ref, w2_ref, wtf_ref,
                    wfc_h_ref, wfc_f_ref, pvh_ref, bfc_ref, out_ref):
    x = jnp.abs(x_ref[...])

    b1, g1, be1 = pvh_ref[0:1, :], pvh_ref[1:2, :], pvh_ref[2:3, :]
    b2, g2, be2 = pvh_ref[3:4, :], pvh_ref[4:5, :], pvh_ref[5:6, :]
    btf = pvh_ref[6:7, :]

    h = jnp.dot(x.astype(w1_ref.dtype), w1_ref[...],
                preferred_element_type=jnp.float32) + b1
    h = jnp.maximum(_ln(h, g1, be1), 0.0)

    h = jnp.dot(h.astype(w2_ref.dtype), w2_ref[...],
                preferred_element_type=jnp.float32) + b2
    h = jnp.maximum(_ln(h, g2, be2), 0.0)

    fe = jnp.dot(ff_ref[...].astype(wtf_ref.dtype), wtf_ref[...],
                 preferred_element_type=jnp.float32) + btf

    # concat-free final layer: two small matmuls summed in an f32 accumulator.
    out = jnp.dot(h.astype(wfc_h_ref.dtype), wfc_h_ref[...],
                  preferred_element_type=jnp.float32)
    out = out + jnp.dot(fe.astype(wfc_f_ref.dtype), wfc_f_ref[...],
                        preferred_element_type=jnp.float32)
    out_ref[...] = (out + bfc_ref[...]).astype(out_ref.dtype)


# ----------------------------------------------------------------------------
# Spec / tiling helpers
# ----------------------------------------------------------------------------
def _resident_spec(shape, buffered):
    """Constant-index_map (VMEM-resident) operand spec.

    `buffered=True` requests single buffering (no double-buffer DMA slot) for
    weights that never change across grid steps.
    """
    index_map = lambda i: (0,) * len(shape)
    if buffered:
        return pl.BlockSpec(shape, index_map, pipeline_mode=pl.Buffered(1))
    return pl.BlockSpec(shape, index_map)


def _batch_tiling(batch, block_b, sublane, per_row_bytes, weight_bytes,
                  vmem_cap):
    tb = _round_up(min(block_b, batch), sublane)
    if batch >= 2 * sublane:
        # >= 2 grid steps so ("parallel",) can shard across v7x's two TCs.
        tb = min(tb, _round_up(_cdiv(batch, 2), sublane))
    # Fit the per-step tile footprint into the generation VMEM budget.
    budget = vmem_cap - weight_bytes - (8 << 20)
    if budget >= sublane * per_row_bytes:
        tb = min(tb, budget // per_row_bytes // sublane * sublane)
    tb = max(int(tb), sublane)
    if tb >= batch:
        return batch, 1            # single full-extent block (always legal)
    return int(tb), _cdiv(batch, tb)


def _compiler_params(vmem_cap):
    return pltpu.CompilerParams(
        dimension_semantics=("parallel",),   # batch axis -> both TCs on v7x
        vmem_limit_bytes=int(vmem_cap),
    )


# ----------------------------------------------------------------------------
# Jitted implementations
# ----------------------------------------------------------------------------
@functools.partial(jax.jit, static_argnames=("block_b", "buffered_weights"))
def _mlp_forward_impl(x, packed, *, block_b, buffered_weights):
    batch, in_f = x.shape
    w1, w2, w3 = packed["w1"], packed["w2"], packed["w3"]
    pvh, pvc = packed["pvh"], packed["pvc"]
    hid = w1.shape[1]
    ncls = w3.shape[1]
    mm_dtype = w1.dtype
    x = x.astype(mm_dtype)                      # no-op in the f32 path

    sublane = 16 if mm_dtype == jnp.bfloat16 else 8
    isz = jnp.dtype(mm_dtype).itemsize
    per_row = 2 * in_f * isz + 2 * ncls * 4 + 6 * hid * 4 + 4 * ncls * 4
    weight_bytes = 2 * sum(int(a.size) * a.dtype.itemsize
                           for a in (w1, w2, w3, pvh, pvc))
    vmem_cap = _vmem_cap_bytes()
    tb, steps = _batch_tiling(batch, block_b, sublane, per_row,
                              weight_bytes, vmem_cap)

    cost = pl.CostEstimate(
        flops=2 * batch * (in_f * hid + hid * hid + hid * ncls),
        transcendentals=3 * batch,
        bytes_accessed=batch * (in_f * isz + ncls * 4) + weight_bytes // 2,
    )

    grid_idx = lambda i: (i, 0)
    return pl.pallas_call(
        mlp_kernel,
        out_shape=jax.ShapeDtypeStruct((batch, ncls), jnp.float32),
        grid=(steps,),
        in_specs=[
            pl.BlockSpec((tb, in_f), grid_idx),            # x, batch-tiled
            _resident_spec((in_f, hid), buffered_weights),  # w1
            _resident_spec((hid, hid), buffered_weights),   # w2
            _resident_spec((hid, ncls), buffered_weights),  # w3
            _resident_spec((6, hid), buffered_weights),     # packed b/g/beta (H)
            _resident_spec((3, ncls), buffered_weights),    # packed b/g/beta (C)
        ],
        out_specs=pl.BlockSpec((tb, ncls), grid_idx),
        compiler_params=_compiler_params(vmem_cap),
        cost_estimate=cost,
    )(x, w1, w2, w3, pvh, pvc)


@functools.partial(jax.jit, static_argnames=("block_b", "buffered_weights"))
def _mlp_forward_stat_impl(flow_feature, x, packed, *, block_b,
                           buffered_weights):
    batch, in_f = x.shape
    stat_f = flow_feature.shape[1]
    w1, w2 = packed["w1"], packed["w2"]
    wtf, wfc_h, wfc_f = packed["wtf"], packed["wfc_h"], packed["wfc_f"]
    pvh, bfc = packed["pvh_stat"], packed["bfc"]
    hid = w1.shape[1]
    ncls = wfc_h.shape[1]
    mm_dtype = w1.dtype
    x = x.astype(mm_dtype)
    flow_feature = flow_feature.astype(mm_dtype)

    sublane = 16 if mm_dtype == jnp.bfloat16 else 8
    isz = jnp.dtype(mm_dtype).itemsize
    per_row = (2 * (in_f + stat_f) * isz + 2 * ncls * 4
               + 8 * hid * 4 + 4 * ncls * 4)
    weight_bytes = 2 * sum(int(a.size) * a.dtype.itemsize
                           for a in (w1, w2, wtf, wfc_h, wfc_f, pvh, bfc))
    vmem_cap = _vmem_cap_bytes()
    tb, steps = _batch_tiling(batch, block_b, sublane, per_row,
                              weight_bytes, vmem_cap)

    cost = pl.CostEstimate(
        flops=2 * batch * (in_f * hid + hid * hid + stat_f * hid
                           + 2 * hid * ncls),
        transcendentals=2 * batch,
        bytes_accessed=batch * ((in_f + stat_f) * isz + ncls * 4)
        + weight_bytes // 2,
    )

    grid_idx = lambda i: (i, 0)
    return pl.pallas_call(
        mlp_stat_kernel,
        out_shape=jax.ShapeDtypeStruct((batch, ncls), jnp.float32),
        grid=(steps,),
        in_specs=[
            pl.BlockSpec((tb, stat_f), grid_idx),             # flow_feature
            pl.BlockSpec((tb, in_f), grid_idx),               # x
            _resident_spec((in_f, hid), buffered_weights),    # w1
            _resident_spec((hid, hid), buffered_weights),     # w2
            _resident_spec((stat_f, hid), buffered_weights),  # wtf
            _resident_spec((hid, ncls), buffered_weights),    # wfc[:H]
            _resident_spec((hid, ncls), buffered_weights),    # wfc[H:]
            _resident_spec((7, hid), buffered_weights),       # packed vectors
            _resident_spec((1, ncls), buffered_weights),      # bfc
        ],
        out_specs=pl.BlockSpec((tb, ncls), grid_idx),
        compiler_params=_compiler_params(vmem_cap),
        cost_estimate=cost,
    )(flow_feature, x, w1, w2, wtf, wfc_h, wfc_f, pvh, bfc)


# ----------------------------------------------------------------------------
# Public wrappers (with one-time probe for pl.Buffered(1) support)
# ----------------------------------------------------------------------------
_BUFFERED_WEIGHTS_SUPPORTED = None


def _dispatch(impl, *args, **kwargs):
    global _BUFFERED_WEIGHTS_SUPPORTED
    if _BUFFERED_WEIGHTS_SUPPORTED is None:
        try:
            out = impl(*args, buffered_weights=True, **kwargs)
            jax.block_until_ready(out)
            _BUFFERED_WEIGHTS_SUPPORTED = True
            return out
        except Exception:
            # pipeline_mode=pl.Buffered(1) unsupported on this jax version;
            # fall back to default double-buffered weight specs.
            _BUFFERED_WEIGHTS_SUPPORTED = False
    return impl(*args, buffered_weights=_BUFFERED_WEIGHTS_SUPPORTED, **kwargs)


def mlp_forward(x, packed_params, *, block_b=4096):
    """config.stat == False path."""
    return _dispatch(_mlp_forward_impl, x, packed_params, block_b=block_b)


def mlp_forward_stat(flow_feature, x, packed_params, *, block_b=4096):
    """config.stat == True path."""
    return _dispatch(_mlp_forward_stat_impl, flow_feature, x, packed_params,
                     block_b=block_b)


# ----------------------------------------------------------------------------
# One-time parameter packing (hoisted out of the per-call hot path)
# ----------------------------------------------------------------------------
def pack_params(params, matmul_dtype=jnp.float32):
    f32 = jnp.float32
    hid = params["w1"].shape[1]
    packed = {
        "w1": params["w1"].astype(matmul_dtype),
        "w2": params["w2"].astype(matmul_dtype),
        "w3": params["w3"].astype(matmul_dtype),
        "pvh": jnp.concatenate(
            [params["b1"], params["g1"], params["be1"],
             params["b2"], params["g2"], params["be2"]], axis=0).astype(f32),
        "pvc": jnp.concatenate(
            [params["b3"], params["g3"], params["be3"]], axis=0).astype(f32),
    }
    if "wfc" in params:
        packed.update({
            "wtf": params["wtf"].astype(matmul_dtype),
            "wfc_h": params["wfc"][:hid].astype(matmul_dtype),
            "wfc_f": params["wfc"][hid:].astype(matmul_dtype),
            "bfc": params["bfc"].astype(f32),
            "pvh_stat": jnp.concatenate(
                [params["b1"], params["g1"], params["be1"],
                 params["b2"], params["g2"], params["be2"],
                 params["btf"]], axis=0).astype(f32),
        })
    return jax.tree_util.tree_map(jax.device_put, packed)


# ----------------------------------------------------------------------------
# Parameter init (matches torch defaults) and pure-JAX reference
# ----------------------------------------------------------------------------
# TODO(synk): the pickle-based dataset-info loading from MLP.__init__ is
# replaced by explicit (max_flow_length, num_classes) ints.
def _linear_init(key, fan_in, fan_out):
    kw, kb = jax.random.split(key)
    bound = 1.0 / jnp.sqrt(jnp.float32(fan_in))
    w = jax.random.uniform(kw, (fan_in, fan_out), jnp.float32, -bound, bound)
    b = jax.random.uniform(kb, (1, fan_out), jnp.float32, -bound, bound)
    return w, b


def init_params(key, input_size, hidden_size, num_classes, stat_dim=39):
    keys = jax.random.split(key, 5)
    w1, b1 = _linear_init(keys[0], input_size, hidden_size)
    w2, b2 = _linear_init(keys[1], hidden_size, hidden_size)
    w3, b3 = _linear_init(keys[2], hidden_size, num_classes)
    wtf, btf = _linear_init(keys[3], stat_dim, hidden_size)
    wfc, bfc = _linear_init(keys[4], 2 * hidden_size, num_classes)
    ones = lambda n: jnp.ones((1, n), jnp.float32)
    zeros = lambda n: jnp.zeros((1, n), jnp.float32)
    return {
        "w1": w1, "b1": b1, "g1": ones(hidden_size), "be1": zeros(hidden_size),
        "w2": w2, "b2": b2, "g2": ones(hidden_size), "be2": zeros(hidden_size),
        "w3": w3, "b3": b3, "g3": ones(num_classes), "be3": zeros(num_classes),
        "wtf": wtf, "btf": btf, "wfc": wfc, "bfc": bfc,
    }


def _reference(x, flow_feature, params, stat):
    def ln(h, g, b):
        m = jnp.mean(h, -1, keepdims=True)
        v = jnp.mean((h - m) ** 2, -1, keepdims=True)
        return (h - m) / jnp.sqrt(v + LN_EPS) * g + b
    h = jnp.abs(x)
    h = jnp.maximum(ln(h @ params["w1"] + params["b1"],
                       params["g1"], params["be1"]), 0.0)
    h = jnp.maximum(ln(h @ params["w2"] + params["b2"],
                       params["g2"], params["be2"]), 0.0)
    if stat:
        fe = flow_feature @ params["wtf"] + params["btf"]
        return jnp.concatenate([h, fe], 1) @ params["wfc"] + params["bfc"]
    h = ln(h @ params["w3"] + params["b3"], params["g3"], params["be3"])
    return jnp.maximum(h, 0.0)


if __name__ == "__main__":
    # max_flow_length (input_size) = 32, rank (hidden) = 32,
    # num_classes = 16, batch = 8, flow_feature dim = 39
    B, INPUT, HIDDEN, NCLS, STAT_DIM = 8, 32, 32, 16, 39

    key = jax.random.PRNGKey(0)
    kp, kx, kf = jax.random.split(key, 3)
    params = init_params(kp, INPUT, HIDDEN, NCLS, STAT_DIM)
    x = jax.random.normal(kx, (B, INPUT), jnp.float32)
    flow_feature = jax.random.normal(kf, (B, STAT_DIM), jnp.float32)

    packed_f32 = pack_params(params, jnp.float32)   # packed ONCE, reused below

    # config.stat = False path
    y = mlp_forward(x, packed_f32)
    jax.block_until_ready(y)
    assert y.shape == (B, NCLS)
    y_ref = _reference(x, flow_feature, params, stat=False)
    assert jnp.allclose(y, y_ref, atol=1e-4, rtol=1e-4), "stat=False mismatch"

    # config.stat = True path
    y2 = mlp_forward_stat(flow_feature, x, packed_f32)
    jax.block_until_ready(y2)
    assert y2.shape == (B, NCLS)
    y2_ref = _reference(x, flow_feature, params, stat=True)
    assert jnp.allclose(y2, y2_ref, atol=1e-4, rtol=1e-4), "stat=True mismatch"

    # Exercise the batch grid: ragged batch (200) with a 64-row tile
    # -> 4 grid steps, partial (8-row) last block handled by Pallas.
    B2 = 200
    kx2, kf2 = jax.random.split(jax.random.PRNGKey(1))
    x2 = jax.random.normal(kx2, (B2, INPUT), jnp.float32)
    ff2 = jax.random.normal(kf2, (B2, STAT_DIM), jnp.float32)
    y3 = mlp_forward(x2, packed_f32, block_b=64)
    jax.block_until_ready(y3)
    assert jnp.allclose(y3, _reference(x2, ff2, params, stat=False),
                        atol=1e-4, rtol=1e-4), "tiled stat=False mismatch"
    y4 = mlp_forward_stat(ff2, x2, packed_f32, block_b=64)
    jax.block_until_ready(y4)
    assert jnp.allclose(y4, _reference(x2, ff2, params, stat=True),
                        atol=1e-4, rtol=1e-4), "tiled stat=True mismatch"

    # bf16 matmul operands (v6e/v7x): inputs cast once in the wrapper, f32
    # accumulation + f32 LayerNorm math.  Expected |err| vs f32 ref ~1e-2.
    packed_bf16 = pack_params(params, jnp.bfloat16)
    yb = mlp_forward(x2, packed_bf16, block_b=64)
    jax.block_until_ready(yb)
    assert jnp.allclose(yb, _reference(x2, ff2, params, stat=False),
                        atol=1e-1, rtol=1e-1), "bf16 stat=False out of tolerance"
    yb2 = mlp_forward_stat(ff2, x2, packed_bf16, block_b=64)
    jax.block_until_ready(yb2)
    assert jnp.allclose(yb2, _reference(x2, ff2, params, stat=True),
                        atol=1e-1, rtol=1e-1), "bf16 stat=True out of tolerance"

    print("KERNEL_OK")
</pallas_src>

<mosaic_0001>
module attributes {stable_mosaic.version = 11 : i64} {
  func.func @mlp_kernel(%arg0: i32, %arg1: memref<8x32xf32, #tpu.memory_space<vmem>>, %arg2: memref<32x32xf32, #tpu.memory_space<vmem>>, %arg3: memref<32x32xf32, #tpu.memory_space<vmem>>, %arg4: memref<32x16xf32, #tpu.memory_space<vmem>>, %arg5: memref<6x32xf32, #tpu.memory_space<vmem>>, %arg6: memref<3x16xf32, #tpu.memory_space<vmem>>, %arg7: memref<8x16xf32, #tpu.memory_space<vmem>>) attributes {dimension_semantics = [#tpu.dimension_semantics<parallel>], iteration_bounds = array<i64: 1>, scalar_prefetch = 0 : i64, scratch_operands = 0 : i64, tpu.core_type = #tpu.core_type<tc>, window_params = [{transform_indices = @transform_0, window_bounds = array<i64: 8, 32>}, {pipeline_mode = #tpu.pipeline_mode<synchronous>, transform_indices = @transform_1, window_bounds = array<i64: 32, 32>}, {pipeline_mode = #tpu.pipeline_mode<synchronous>, transform_indices = @transform_2, window_bounds = array<i64: 32, 32>}, {pipeline_mode = #tpu.pipeline_mode<synchronous>, transform_indices = @transform_3, window_bounds = array<i64: 32, 16>}, {pipeline_mode = #tpu.pipeline_mode<synchronous>, transform_indices = @transform_4, window_bounds = array<i64: 6, 32>}, {pipeline_mode = #tpu.pipeline_mode<synchronous>, transform_indices = @transform_5, window_bounds = array<i64: 3, 16>}, {transform_indices = @transform_6, window_bounds = array<i64: 8, 16>}]} {
    %c0 = arith.constant 0 : index
    %c0_0 = arith.constant 0 : index
    %0 = vector.load %arg1[%c0, %c0_0] : memref<8x32xf32, #tpu.memory_space<vmem>>, vector<8x32xf32>
    %1 = math.absf %0 : vector<8x32xf32>
    %c0_1 = arith.constant 0 : index
    %c0_2 = arith.constant 0 : index
    %2 = vector.load %arg5[%c0_1, %c0_2] : memref<6x32xf32, #tpu.memory_space<vmem>>, vector<1x32xf32>
    %c1 = arith.constant 1 : index
    %c0_3 = arith.constant 0 : index
    %3 = vector.load %arg5[%c1, %c0_3] : memref<6x32xf32, #tpu.memory_space<vmem>>, vector<1x32xf32>
    %c2 = arith.constant 2 : index
    %c0_4 = arith.constant 0 : index
    %4 = vector.load %arg5[%c2, %c0_4] : memref<6x32xf32, #tpu.memory_space<vmem>>, vector<1x32xf32>
    %c3 = arith.constant 3 : index
    %c0_5 = arith.constant 0 : index
    %5 = vector.load %arg5[%c3, %c0_5] : memref<6x32xf32, #tpu.memory_space<vmem>>, vector<1x32xf32>
    %c4 = arith.constant 4 : index
    %c0_6 = arith.constant 0 : index
    %6 = vector.load %arg5[%c4, %c0_6] : memref<6x32xf32, #tpu.memory_space<vmem>>, vector<1x32xf32>
    %c5 = arith.constant 5 : index
    %c0_7 = arith.constant 0 : index
    %7 = vector.load %arg5[%c5, %c0_7] : memref<6x32xf32, #tpu.memory_space<vmem>>, vector<1x32xf32>
    %c0_8 = arith.constant 0 : index
    %c0_9 = arith.constant 0 : index
    %8 = vector.load %arg6[%c0_8, %c0_9] : memref<3x16xf32, #tpu.memory_space<vmem>>, vector<1x16xf32>
    %c1_10 = arith.constant 1 : index
    %c0_11 = arith.constant 0 : index
    %9 = vector.load %arg6[%c1_10, %c0_11] : memref<3x16xf32, #tpu.memory_space<vmem>>, vector<1x16xf32>
    %c2_12 = arith.constant 2 : index
    %c0_13 = arith.constant 0 : index
    %10 = vector.load %arg6[%c2_12, %c0_13] : memref<3x16xf32, #tpu.memory_space<vmem>>, vector<1x16xf32>
    %c0_14 = arith.constant 0 : index
    %c0_15 = arith.constant 0 : index
    %11 = vector.load %arg2[%c0_14, %c0_15] : memref<32x32xf32, #tpu.memory_space<vmem>>, vector<32x32xf32>
    %cst = arith.constant dense<0.000000e+00> : vector<8x32xf32>
    %12 = tpu.matmul %1, %11, %cst {dimension_numbers = #tpu.dot_dimension_numbers<[1], [0], [0], [1], [0, 0, 1, 1], [], []>} : vector<8x32xf32>, vector<32x32xf32>, vector<8x32xf32> -> vector<8x32xf32>
    %13 = vector.broadcast %2 : vector<1x32xf32> to vector<8x32xf32>
    %14 = arith.addf %12, %13 : vector<8x32xf32>
    %cst_16 = arith.constant dense<0.000000e+00> : vector<8xf32>
    %15 = vector.multi_reduction <add>, %14, %cst_16 [1] : vector<8x32xf32> to vector<8xf32>
    %16 = vector.shape_cast %15 : vector<8xf32> to vector<8x1xf32>
    %cst_17 = arith.constant 3.200000e+01 : f32
    %17 = vector.broadcast %cst_17 : f32 to vector<8x1xf32>
    %18 = arith.divf %16, %17 : vector<8x1xf32>
    %19 = arith.mulf %14, %14 : vector<8x32xf32>
    %cst_18 = arith.constant dense<0.000000e+00> : vector<8xf32>
    %20 = vector.multi_reduction <add>, %19, %cst_18 [1] : vector<8x32xf32> to vector<8xf32>
    %21 = vector.shape_cast %20 : vector<8xf32> to vector<8x1xf32>
    %cst_19 = arith.constant 3.200000e+01 : f32
    %22 = vector.broadcast %cst_19 : f32 to vector<8x1xf32>
    %23 = arith.divf %21, %22 : vector<8x1xf32>
    %24 = arith.mulf %18, %18 : vector<8x1xf32>
    %25 = arith.subf %23, %24 : vector<8x1xf32>
    %cst_20 = arith.constant 0.000000e+00 : f32
    %26 = vector.broadcast %cst_20 : f32 to vector<8x1xf32>
    %27 = arith.maximumf %25, %26 : vector<8x1xf32>
    %28 = vector.broadcast %18 : vector<8x1xf32> to vector<8x32xf32>
    %29 = arith.subf %14, %28 : vector<8x32xf32>
    %cst_21 = arith.constant 9.99999974E-6 : f32
    %30 = vector.broadcast %cst_21 : f32 to vector<8x1xf32>
    %31 = arith.addf %27, %30 : vector<8x1xf32>
    %32 = math.rsqrt %31 : vector<8x1xf32>
    %33 = vector.broadcast %32 : vector<8x1xf32> to vector<8x32xf32>
    %34 = arith.mulf %29, %33 : vector<8x32xf32>
    %35 = vector.broadcast %3 : vector<1x32xf32> to vector<8x32xf32>
    %36 = arith.mulf %34, %35 : vector<8x32xf32>
    %37 = vector.broadcast %4 : vector<1x32xf32> to vector<8x32xf32>
    %38 = arith.addf %36, %37 : vector<8x32xf32>
    %cst_22 = arith.constant 0.000000e+00 : f32
    %39 = vector.broadcast %cst_22 : f32 to vector<8x32xf32>
    %40 = arith.maximumf %38, %39 : vector<8x32xf32>
    %c0_23 = arith.constant 0 : index
    %c0_24 = arith.constant 0 : index
    %41 = vector.load %arg3[%c0_23, %c0_24] : memref<32x32xf32, #tpu.memory_space<vmem>>, vector<32x32xf32>
    %cst_25 = arith.constant dense<0.000000e+00> : vector<8x32xf32>
    %42 = tpu.matmul %40, %41, %cst_25 {dimension_numbers = #tpu.dot_dimension_numbers<[1], [0], [0], [1], [0, 0, 1, 1], [], []>} : vector<8x32xf32>, vector<32x32xf32>, vector<8x32xf32> -> vector<8x32xf32>
    %43 = vector.broadcast %5 : vector<1x32xf32> to vector<8x32xf32>
    %44 = arith.addf %42, %43 : vector<8x32xf32>
    %cst_26 = arith.constant dense<0.000000e+00> : vector<8xf32>
    %45 = vector.multi_reduction <add>, %44, %cst_26 [1] : vector<8x32xf32> to vector<8xf32>
    %46 = vector.shape_cast %45 : vector<8xf32> to vector<8x1xf32>
    %cst_27 = arith.constant 3.200000e+01 : f32
    %47 = vector.broadcast %cst_27 : f32 to vector<8x1xf32>
    %48 = arith.divf %46, %47 : vector<8x1xf32>
    %49 = arith.mulf %44, %44 : vector<8x32xf32>
    %cst_28 = arith.constant dense<0.000000e+00> : vector<8xf32>
    %50 = vector.multi_reduction <add>, %49, %cst_28 [1] : vector<8x32xf32> to vector<8xf32>
    %51 = vector.shape_cast %50 : vector<8xf32> to vector<8x1xf32>
    %cst_29 = arith.constant 3.200000e+01 : f32
    %52 = vector.broadcast %cst_29 : f32 to vector<8x1xf32>
    %53 = arith.divf %51, %52 : vector<8x1xf32>
    %54 = arith.mulf %48, %48 : vector<8x1xf32>
    %55 = arith.subf %53, %54 : vector<8x1xf32>
    %cst_30 = arith.constant 0.000000e+00 : f32
    %56 = vector.broadcast %cst_30 : f32 to vector<8x1xf32>
    %57 = arith.maximumf %55, %56 : vector<8x1xf32>
    %58 = vector.broadcast %48 : vector<8x1xf32> to vector<8x32xf32>
    %59 = arith.subf %44, %58 : vector<8x32xf32>
    %cst_31 = arith.constant 9.99999974E-6 : f32
    %60 = vector.broadcast %cst_31 : f32 to vector<8x1xf32>
    %61 = arith.addf %57, %60 : vector<8x1xf32>
    %62 = math.rsqrt %61 : vector<8x1xf32>
    %63 = vector.broadcast %62 : vector<8x1xf32> to vector<8x32xf32>
    %64 = arith.mulf %59, %63 : vector<8x32xf32>
    %65 = vector.broadcast %6 : vector<1x32xf32> to vector<8x32xf32>
    %66 = arith.mulf %64, %65 : vector<8x32xf32>
    %67 = vector.broadcast %7 : vector<1x32xf32> to vector<8x32xf32>
    %68 = arith.addf %66, %67 : vector<8x32xf32>
    %cst_32 = arith.constant 0.000000e+00 : f32
    %69 = vector.broadcast %cst_32 : f32 to vector<8x32xf32>
    %70 = arith.maximumf %68, %69 : vector<8x32xf32>
    %c0_33 = arith.constant 0 : index
    %c0_34 = arith.constant 0 : index
    %71 = vector.load %arg4[%c0_33, %c0_34] : memref<32x16xf32, #tpu.memory_space<vmem>>, vector<32x16xf32>
    %cst_35 = arith.constant dense<0.000000e+00> : vector<8x16xf32>
    %72 = tpu.matmul %70, %71, %cst_35 {dimension_numbers = #tpu.dot_dimension_numbers<[1], [0], [0], [1], [0, 0, 1, 1], [], []>} : vector<8x32xf32>, vector<32x16xf32>, vector<8x16xf32> -> vector<8x16xf32>
    %73 = vector.broadcast %8 : vector<1x16xf32> to vector<8x16xf32>
    %74 = arith.addf %72, %73 : vector<8x16xf32>
    %cst_36 = arith.constant dense<0.000000e+00> : vector<8xf32>
    %75 = vector.multi_reduction <add>, %74, %cst_36 [1] : vector<8x16xf32> to vector<8xf32>
    %76 = vector.shape_cast %75 : vector<8xf32> to vector<8x1xf32>
    %cst_37 = arith.constant 1.600000e+01 : f32
    %77 = vector.broadcast %cst_37 : f32 to vector<8x1xf32>
    %78 = arith.divf %76, %77 : vector<8x1xf32>
    %79 = arith.mulf %74, %74 : vector<8x16xf32>
    %cst_38 = arith.constant dense<0.000000e+00> : vector<8xf32>
    %80 = vector.multi_reduction <add>, %79, %cst_38 [1] : vector<8x16xf32> to vector<8xf32>
    %81 = vector.shape_cast %80 : vector<8xf32> to vector<8x1xf32>
    %cst_39 = arith.constant 1.600000e+01 : f32
    %82 = vector.broadcast %cst_39 : f32 to vector<8x1xf32>
    %83 = arith.divf %81, %82 : vector<8x1xf32>
    %84 = arith.mulf %78, %78 : vector<8x1xf32>
    %85 = arith.subf %83, %84 : vector<8x1xf32>
    %cst_40 = arith.constant 0.000000e+00 : f32
    %86 = vector.broadcast %cst_40 : f32 to vector<8x1xf32>
    %87 = arith.maximumf %85, %86 : vector<8x1xf32>
    %88 = vector.broadcast %78 : vector<8x1xf32> to vector<8x16xf32>
    %89 = arith.subf %74, %88 : vector<8x16xf32>
    %cst_41 = arith.constant 9.99999974E-6 : f32
    %90 = vector.broadcast %cst_41 : f32 to vector<8x1xf32>
    %91 = arith.addf %87, %90 : vector<8x1xf32>
    %92 = math.rsqrt %91 : vector<8x1xf32>
    %93 = vector.broadcast %92 : vector<8x1xf32> to vector<8x16xf32>
    %94 = arith.mulf %89, %93 : vector<8x16xf32>
    %95 = vector.broadcast %9 : vector<1x16xf32> to vector<8x16xf32>
    %96 = arith.mulf %94, %95 : vector<8x16xf32>
    %97 = vector.broadcast %10 : vector<1x16xf32> to vector<8x16xf32>
    %98 = arith.addf %96, %97 : vector<8x16xf32>
    %cst_42 = arith.constant 0.000000e+00 : f32
    %99 = vector.broadcast %cst_42 : f32 to vector<8x16xf32>
    %100 = arith.maximumf %98, %99 : vector<8x16xf32>
    %c0_43 = arith.constant 0 : index
    %c0_44 = arith.constant 0 : index
    %101 = vector.load %arg7[%c0_43, %c0_44] : memref<8x16xf32, #tpu.memory_space<vmem>>, vector<8x16xf32>
    tpu.vector_store %arg7[%c0_43, %c0_44], %100 {strides = array<i32>} : memref<8x16xf32, #tpu.memory_space<vmem>>, vector<8x16xf32>,
    return
  }
  func.func @transform_0(%arg0: i32) -> (i32, i32) {
    %c0_i32 = arith.constant 0 : i32
    %c0_i32_0 = arith.constant 0 : i32
    return %arg0, %c0_i32 : i32, i32
  }
  func.func @transform_1(%arg0: i32) -> (i32, i32) {
    %c0_i32 = arith.constant 0 : i32
    %c0_i32_0 = arith.constant 0 : i32
    %c0_i32_1 = arith.constant 0 : i32
    return %c0_i32, %c0_i32_0 : i32, i32
  }
  func.func @transform_2(%arg0: i32) -> (i32, i32) {
    %c0_i32 = arith.constant 0 : i32
    %c0_i32_0 = arith.constant 0 : i32
    %c0_i32_1 = arith.constant 0 : i32
    return %c0_i32, %c0_i32_0 : i32, i32
  }
  func.func @transform_3(%arg0: i32) -> (i32, i32) {
    %c0_i32 = arith.constant 0 : i32
    %c0_i32_0 = arith.constant 0 : i32
    %c0_i32_1 = arith.constant 0 : i32
    return %c0_i32, %c0_i32_0 : i32, i32
  }
  func.func @transform_4(%arg0: i32) -> (i32, i32) {
    %c0_i32 = arith.constant 0 : i32
    %c0_i32_0 = arith.constant 0 : i32
    %c0_i32_1 = arith.constant 0 : i32
    return %c0_i32, %c0_i32_0 : i32, i32
  }
  func.func @transform_5(%arg0: i32) -> (i32, i32) {
    %c0_i32 = arith.constant 0 : i32
    %c0_i32_0 = arith.constant 0 : i32
    %c0_i32_1 = arith.constant 0 : i32
    return %c0_i32, %c0_i32_0 : i32, i32
  }
  func.func @transform_6(%arg0: i32) -> (i32, i32) {
    %c0_i32 = arith.constant 0 : i32
    %c0_i32_0 = arith.constant 0 : i32
    return %arg0, %c0_i32 : i32, i32
  }
}

module attributes {stable_mosaic.version = 11 : i64} {
  func.func @mlp_kernel(%arg0: i32, %arg1: memref<8x32xf32, #tpu.memory_space<vmem>>, %arg2: memref<32x32xf32, #tpu.memory_space<vmem>>, %arg3: memref<32x32xf32, #tpu.memory_space<vmem>>, %arg4: memref<32x16xf32, #tpu.memory_space<vmem>>, %arg5: memref<6x32xf32, #tpu.memory_space<vmem>>, %arg6: memref<3x16xf32, #tpu.memory_space<vmem>>, %arg7: memref<8x16xf32, #tpu.memory_space<vmem>>) attributes {dimension_semantics = [#tpu.dimension_semantics<parallel>], iteration_bounds = array<i64: 1>, scalar_prefetch = 0 : i64, scratch_operands = 0 : i64, tpu.core_type = #tpu.core_type<tc>, window_params = [{transform_indices = @transform_0, window_bounds = array<i64: 8, 32>}, {pipeline_mode = #tpu.pipeline_mode<synchronous>, transform_indices = @transform_1, window_bounds = array<i64: 32, 32>}, {pipeline_mode = #tpu.pipeline_mode<synchronous>, transform_indices = @transform_2, window_bounds = array<i64: 32, 32>}, {pipeline_mode = #tpu.pipeline_mode<synchronous>, transform_indices = @transform_3, window_bounds = array<i64: 32, 16>}, {pipeline_mode = #tpu.pipeline_mode<synchronous>, transform_indices = @transform_4, window_bounds = array<i64: 6, 32>}, {pipeline_mode = #tpu.pipeline_mode<synchronous>, transform_indices = @transform_5, window_bounds = array<i64: 3, 16>}, {transform_indices = @transform_6, window_bounds = array<i64: 8, 16>}]} {
    %c0 = arith.constant 0 : index
    %c0_0 = arith.constant 0 : index
    %0 = vector.load %arg1[%c0, %c0_0] : memref<8x32xf32, #tpu.memory_space<vmem>>, vector<8x32xf32>
    %1 = math.absf %0 : vector<8x32xf32>
    %c0_1 = arith.constant 0 : index
    %c0_2 = arith.constant 0 : index
    %2 = vector.load %arg5[%c0_1, %c0_2] : memref<6x32xf32, #tpu.memory_space<vmem>>, vector<1x32xf32>
    %c1 = arith.constant 1 : index
    %c0_3 = arith.constant 0 : index
    %3 = vector.load %arg5[%c1, %c0_3] : memref<6x32xf32, #tpu.memory_space<vmem>>, vector<1x32xf32>
    %c2 = arith.constant 2 : index
    %c0_4 = arith.constant 0 : index
    %4 = vector.load %arg5[%c2, %c0_4] : memref<6x32xf32, #tpu.memory_space<vmem>>, vector<1x32xf32>
    %c3 = arith.constant 3 : index
    %c0_5 = arith.constant 0 : index
    %5 = vector.load %arg5[%c3, %c0_5] : memref<6x32xf32, #tpu.memory_space<vmem>>, vector<1x32xf32>
    %c4 = arith.constant 4 : index
    %c0_6 = arith.constant 0 : index
    %6 = vector.load %arg5[%c4, %c0_6] : memref<6x32xf32, #tpu.memory_space<vmem>>, vector<1x32xf32>
    %c5 = arith.constant 5 : index
    %c0_7 = arith.constant 0 : index
    %7 = vector.load %arg5[%c5, %c0_7] : memref<6x32xf32, #tpu.memory_space<vmem>>, vector<1x32xf32>
    %c0_8 = arith.constant 0 : index
    %c0_9 = arith.constant 0 : index
    %8 = vector.load %arg6[%c0_8, %c0_9] : memref<3x16xf32, #tpu.memory_space<vmem>>, vector<1x16xf32>
    %c1_10 = arith.constant 1 : index
    %c0_11 = arith.constant 0 : index
    %9 = vector.load %arg6[%c1_10, %c0_11] : memref<3x16xf32, #tpu.memory_space<vmem>>, vector<1x16xf32>
    %c2_12 = arith.constant 2 : index
    %c0_13 = arith.constant 0 : index
    %10 = vector.load %arg6[%c2_12, %c0_13] : memref<3x16xf32, #tpu.memory_space<vmem>>, vector<1x16xf32>
    %c0_14 = arith.constant 0 : index
    %c0_15 = arith.constant 0 : index
    %11 = vector.load %arg2[%c0_14, %c0_15] : memref<32x32xf32, #tpu.memory_space<vmem>>, vector<32x32xf32>
    %cst = arith.constant dense<0.000000e+00> : vector<8x32xf32>
    %12 = tpu.matmul %1, %11, %cst {dimension_numbers = #tpu.dot_dimension_numbers<[1], [0], [0], [1], [0, 0, 1, 1], [], []>} : vector<8x32xf32>, vector<32x32xf32>, vector<8x32xf32> -> vector<8x32xf32>
    %13 = vector.broadcast %2 : vector<1x32xf32> to vector<8x32xf32>
    %14 = arith.addf %12, %13 : vector<8x32xf32>
    %cst_16 = arith.constant dense<0.000000e+00> : vector<8xf32>
    %15 = vector.multi_reduction <add>, %14, %cst_16 [1] : vector<8x32xf32> to vector<8xf32>
    %16 = vector.shape_cast %15 : vector<8xf32> to vector<8x1xf32>
    %cst_17 = arith.constant 3.200000e+01 : f32
    %17 = vector.broadcast %cst_17 : f32 to vector<8x1xf32>
    %18 = arith.divf %16, %17 : vector<8x1xf32>
    %19 = arith.mulf %14, %14 : vector<8x32xf32>
    %cst_18 = arith.constant dense<0.000000e+00> : vector<8xf32>
    %20 = vector.multi_reduction <add>, %19, %cst_18 [1] : vector<8x32xf32> to vector<8xf32>
    %21 = vector.shape_cast %20 : vector<8xf32> to vector<8x1xf32>
    %cst_19 = arith.constant 3.200000e+01 : f32
    %22 = vector.broadcast %cst_19 : f32 to vector<8x1xf32>
    %23 = arith.divf %21, %22 : vector<8x1xf32>
    %24 = arith.mulf %18, %18 : vector<8x1xf32>
    %25 = arith.subf %23, %24 : vector<8x1xf32>
    %cst_20 = arith.constant 0.000000e+00 : f32
    %26 = vector.broadcast %cst_20 : f32 to vector<8x1xf32>
    %27 = arith.maximumf %25, %26 : vector<8x1xf32>
    %28 = vector.broadcast %18 : vector<8x1xf32> to vector<8x32xf32>
    %29 = arith.subf %14, %28 : vector<8x32xf32>
    %cst_21 = arith.constant 9.99999974E-6 : f32
    %30 = vector.broadcast %cst_21 : f32 to vector<8x1xf32>
    %31 = arith.addf %27, %30 : vector<8x1xf32>
    %32 = math.rsqrt %31 : vector<8x1xf32>
    %33 = vector.broadcast %32 : vector<8x1xf32> to vector<8x32xf32>
    %34 = arith.mulf %29, %33 : vector<8x32xf32>
    %35 = vector.broadcast %3 : vector<1x32xf32> to vector<8x32xf32>
    %36 = arith.mulf %34, %35 : vector<8x32xf32>
    %37 = vector.broadcast %4 : vector<1x32xf32> to vector<8x32xf32>
    %38 = arith.addf %36, %37 : vector<8x32xf32>
    %cst_22 = arith.constant 0.000000e+00 : f32
    %39 = vector.broadcast %cst_22 : f32 to vector<8x32xf32>
    %40 = arith.maximumf %38, %39 : vector<8x32xf32>
    %c0_23 = arith.constant 0 : index
    %c0_24 = arith.constant 0 : index
    %41 = vector.load %arg3[%c0_23, %c0_24] : memref<32x32xf32, #tpu.memory_space<vmem>>, vector<32x32xf32>
    %cst_25 = arith.constant dense<0.000000e+00> : vector<8x32xf32>
    %42 = tpu.matmul %40, %41, %cst_25 {dimension_numbers = #tpu.dot_dimension_numbers<[1], [0], [0], [1], [0, 0, 1, 1], [], []>} : vector<8x32xf32>, vector<32x32xf32>, vector<8x32xf32> -> vector<8x32xf32>
    %43 = vector.broadcast %5 : vector<1x32xf32> to vector<8x32xf32>
    %44 = arith.addf %42, %43 : vector<8x32xf32>
    %cst_26 = arith.constant dense<0.000000e+00> : vector<8xf32>
    %45 = vector.multi_reduction <add>, %44, %cst_26 [1] : vector<8x32xf32> to vector<8xf32>
    %46 = vector.shape_cast %45 : vector<8xf32> to vector<8x1xf32>
    %cst_27 = arith.constant 3.200000e+01 : f32
    %47 = vector.broadcast %cst_27 : f32 to vector<8x1xf32>
    %48 = arith.divf %46, %47 : vector<8x1xf32>
    %49 = arith.mulf %44, %44 : vector<8x32xf32>
    %cst_28 = arith.constant dense<0.000000e+00> : vector<8xf32>
    %50 = vector.multi_reduction <add>, %49, %cst_28 [1] : vector<8x32xf32> to vector<8xf32>
    %51 = vector.shape_cast %50 : vector<8xf32> to vector<8x1xf32>
    %cst_29 = arith.constant 3.200000e+01 : f32
    %52 = vector.broadcast %cst_29 : f32 to vector<8x1xf32>
    %53 = arith.divf %51, %52 : vector<8x1xf32>
    %54 = arith.mulf %48, %48 : vector<8x1xf32>
    %55 = arith.subf %53, %54 : vector<8x1xf32>
    %cst_30 = arith.constant 0.000000e+00 : f32
    %56 = vector.broadcast %cst_30 : f32 to vector<8x1xf32>
    %57 = arith.maximumf %55, %56 : vector<8x1xf32>
    %58 = vector.broadcast %48 : vector<8x1xf32> to vector<8x32xf32>
    %59 = arith.subf %44, %58 : vector<8x32xf32>
    %cst_31 = arith.constant 9.99999974E-6 : f32
    %60 = vector.broadcast %cst_31 : f32 to vector<8x1xf32>
    %61 = arith.addf %57, %60 : vector<8x1xf32>
    %62 = math.rsqrt %61 : vector<8x1xf32>
    %63 = vector.broadcast %62 : vector<8x1xf32> to vector<8x32xf32>
    %64 = arith.mulf %59, %63 : vector<8x32xf32>
    %65 = vector.broadcast %6 : vector<1x32xf32> to vector<8x32xf32>
    %66 = arith.mulf %64, %65 : vector<8x32xf32>
    %67 = vector.broadcast %7 : vector<1x32xf32> to vector<8x32xf32>
    %68 = arith.addf %66, %67 : vector<8x32xf32>
    %cst_32 = arith.constant 0.000000e+00 : f32
    %69 = vector.broadcast %cst_32 : f32 to vector<8x32xf32>
    %70 = arith.maximumf %68, %69 : vector<8x32xf32>
    %c0_33 = arith.constant 0 : index
    %c0_34 = arith.constant 0 : index
    %71 = vector.load %arg4[%c0_33, %c0_34] : memref<32x16xf32, #tpu.memory_space<vmem>>, vector<32x16xf32>
    %cst_35 = arith.constant dense<0.000000e+00> : vector<8x16xf32>
    %72 = tpu.matmul %70, %71, %cst_35 {dimension_numbers = #tpu.dot_dimension_numbers<[1], [0], [0], [1], [0, 0, 1, 1], [], []>} : vector<8x32xf32>, vector<32x16xf32>, vector<8x16xf32> -> vector<8x16xf32>
    %73 = vector.broadcast %8 : vector<1x16xf32> to vector<8x16xf32>
    %74 = arith.addf %72, %73 : vector<8x16xf32>
    %cst_36 = arith.constant dense<0.000000e+00> : vector<8xf32>
    %75 = vector.multi_reduction <add>, %74, %cst_36 [1] : vector<8x16xf32> to vector<8xf32>
    %76 = vector.shape_cast %75 : vector<8xf32> to vector<8x1xf32>
    %cst_37 = arith.constant 1.600000e+01 : f32
    %77 = vector.broadcast %cst_37 : f32 to vector<8x1xf32>
    %78 = arith.divf %76, %77 : vector<8x1xf32>
    %79 = arith.mulf %74, %74 : vector<8x16xf32>
    %cst_38 = arith.constant dense<0.000000e+00> : vector<8xf32>
    %80 = vector.multi_reduction <add>, %79, %cst_38 [1] : vector<8x16xf32> to vector<8xf32>
    %81 = vector.shape_cast %80 : vector<8xf32> to vector<8x1xf32>
    %cst_39 = arith.constant 1.600000e+01 : f32
    %82 = vector.broadcast %cst_39 : f32 to vector<8x1xf32>
    %83 = arith.divf %81, %82 : vector<8x1xf32>
    %84 = arith.mulf %78, %78 : vector<8x1xf32>
    %85 = arith.subf %83, %84 : vector<8x1xf32>
    %cst_40 = arith.constant 0.000000e+00 : f32
    %86 = vector.broadcast %cst_40 : f32 to vector<8x1xf32>
    %87 = arith.maximumf %85, %86 : vector<8x1xf32>
    %88 = vector.broadcast %78 : vector<8x1xf32> to vector<8x16xf32>
    %89 = arith.subf %74, %88 : vector<8x16xf32>
    %cst_41 = arith.constant 9.99999974E-6 : f32
    %90 = vector.broadcast %cst_41 : f32 to vector<8x1xf32>
    %91 = arith.addf %87, %90 : vector<8x1xf32>
    %92 = math.rsqrt %91 : vector<8x1xf32>
    %93 = vector.broadcast %92 : vector<8x1xf32> to vector<8x16xf32>
    %94 = arith.mulf %89, %93 : vector<8x16xf32>
    %95 = vector.broadcast %9 : vector<1x16xf32> to vector<8x16xf32>
    %96 = arith.mulf %94, %95 : vector<8x16xf32>
    %97 = vector.broadcast %10 : vector<1x16xf32> to vector<8x16xf32>
    %98 = arith.addf %96, %97 : vector<8x16xf32>
    %cst_42 = arith.constant 0.000000e+00 : f32
    %99 = vector.broadcast %cst_42 : f32 to vector<8x16xf32>
    %100 = arith.maximumf %98, %99 : vector<8x16xf32>
    %c0_43 = arith.constant 0 : index
    %c0_44 = arith.constant 0 : index
    %101 = vector.load %arg7[%c0_43, %c0_44] : memref<8x16xf32, #tpu.memory_space<vmem>>, vector<8x16xf32>
    tpu.vector_store %arg7[%c0_43, %c0_44], %100 {strides = array<i32>} : memref<8x16xf32, #tpu.memory_space<vmem>>, vector<8x16xf32>,
    return
  }
  func.func @transform_0(%arg0: i32) -> (i32, i32) {
    %c0_i32 = arith.constant 0 : i32
    %c0_i32_0 = arith.constant 0 : i32
    return %arg0, %c0_i32 : i32, i32
  }
  func.func @transform_1(%arg0: i32) -> (i32, i32) {
    %c0_i32 = arith.constant 0 : i32
    %c0_i32_0 = arith.constant 0 : i32
    %c0_i32_1 = arith.constant 0 : i32
    return %c0_i32, %c0_i32_0 : i32, i32
  }
  func.func @transform_2(%arg0: i32) -> (i32, i32) {
    %c0_i32 = arith.constant 0 : i32
    %c0_i32_0 = arith.constant 0 : i32
    %c0_i32_1 = arith.constant 0 : i32
    return %c0_i32, %c0_i32_0 : i32, i32
  }
  func.func @transform_3(%arg0: i32) -> (i32, i32) {
    %c0_i32 = arith.constant 0 : i32
    %c0_i32_0 = arith.constant 0 : i32
    %c0_i32_1 = arith.constant 0 : i32
    return %c0_i32, %c0_i32_0 : i32, i32
  }
  func.func @transform_4(%arg0: i32) -> (i32, i32) {
    %c0_i32 = arith.constant 0 : i32
    %c0_i32_0 = arith.constant 0 : i32
    %c0_i32_1 = arith.constant 0 : i32
    return %c0_i32, %c0_i32_0 : i32, i32
  }
  func.func @transform_5(%arg0: i32) -> (i32, i32) {
    %c0_i32 = arith.constant 0 : i32
    %c0_i32_0 = arith.constant 0 : i32
    %c0_i32_1 = arith.constant 0 : i32
    return %c0_i32, %c0_i32_0 : i32, i32
  }
  func.func @transform_6(%arg0: i32) -> (i32, i32) {
    %c0_i32 = arith.constant 0 : i32
    %c0_i32_0 = arith.constant 0 : i32
    return %arg0, %c0_i32 : i32, i32
  }
}

</mosaic_0001>

<bundles_post_ra>
// kernel: _mlp_forward_impl.1
= control target key start
LH: loop header
LB: loop body
LE: loop exit
PB: predicated region body
PF: predicated region fallthrough
CT: control target
= control target key end

     0   :  { %11 = vsyncpa [#allocation3], 0  ;;  %s487_s0 = inlined_call_operand.vmem [shape: f32[8,32], index: 0, kind: input, shape index: {}]   ;;  %s488_s1 = inlined_call_operand.vmem [shape: f32[32,32], index: 1, kind: input, shape index: {}]   ;;  %s489_s2 = inlined_call_operand.hbm [shape: f32[32,32], index: 2, kind: input, shape index: {}]   ;;  %s490_s3 = inlined_call_operand.vmem [shape: f32[32,16], index: 3, kind: input, shape index: {}]   ;;  %s491_s4 = inlined_call_operand.vmem [shape: f32[6,32], index: 4, kind: input, shape index: {}]   ;;  %s492_s5 = inlined_call_operand.hbm [shape: f32[3,16], index: 5, kind: input, shape index: {}]   ;;  %s493_s6 = inlined_call_operand.hbm [shape: f32[8,16], index: 6, kind: output, shape index: {}]  }
   0x1   :  { %12 = vsyncpa [#allocation6], 0 }
   0x2   :  { %13 = vsyncpa [#allocation4], 0  ;;  %s22_s23 = sshll.u32 %s489_s2, 4  ;;  %s381_s24 = smov [#allocation2]   ;;  %s23_s23 = int_to_ptr.hbm [resolvable:$true] %s22_s23 }
   0x3   :  { %s24_s25 = sshll.u32 %s381_s24, 4  ;;  %s40_s28 = sshll.u32 %s492_s5, 4  ;;  %s25_s25 = int_to_ptr.vmem [resolvable:$true] %s24_s25  ;;  %s41_s28 = int_to_ptr.hbm [resolvable:$true] %s40_s28 }
   0x4   :  { %s382_s29 = smov 128   ;;  %s383_s30 = smov 8  }
   0x5   :  { %30 = dma.hbm_to_vmem [thread:$0]  %s23_s23, 512, %s25_s25, [#allocation3], %s382_s29, %s382_s29, %s383_s30  }
   0x6   :  { %s384_s7 = smov [#allocation5]  }
   0x7   :  { %s42_s8 = sshll.u32 %s384_s7, 4  ;;  %s43_s8 = int_to_ptr.vmem [resolvable:$true] %s42_s8 }
   0x8   :  { %45 = dma.hbm_to_vmem [thread:$0]  %s41_s28, 64, %s43_s8, [#allocation6]  }
   0x9   :  { %375 = dma.done.wait [#allocation3], 512  }
   0xa   :  { %376 = vsyncadd [#allocation3], 4294966784 }
   0xb   :  { %377 = dma.done.wait [#allocation6], 64  }
   0xc   :  { %378 = vsyncadd [#allocation6], 4294967232  ;;  %v68_v0 = vld [vmem:[%s488_s1 + $0x18] sm:$0xff]  ;;  %v67_v1 = vld [vmem:[%s488_s1 + $0x10] sm:$0xff]  ;;  %vm70_vm0 = vcmask 261120   ;;  %v385_v12 = vmov 32.0  }
   0xd   :  { %86 = vmatpush.msra.mxu0 %v68_v0  ;;  %v54_v2 = vld [vmem:[%s487_s0] sm:$0xff]  ;;  %v66_v3 = vld [vmem:[%s488_s1 + $0x8] sm:$0xff]  ;;  %293 = vrcp.f32 %v385_v12  ;;  %v134_v19 = vld [vmem:[#allocation2 + $0x18] sm:$0xff]  ;;  %vm217_vm8 = vcmask 130048   ;;  %s263_s5 = sshll.u32 %s493_s6, 4  ;;  %s264_s5 = int_to_ptr.hbm [resolvable:$true] %s263_s5 }
   0xe   :  { %v65_v4 = vld [vmem:[%s488_s1] sm:$0xff]  ;;  %v55_v5 = vand.u32 2147483647, %v54_v2  ;;  %v133_v20 = vld [vmem:[#allocation2 + $0x10] sm:$0xff]  ;;  %151 = vmatpush.msra.mxu1 %v134_v19  ;;  %v132_v22 = vld [vmem:[#allocation2 + $0x8] sm:$0xff]  ;;  %v386_v19 = vmov 16.0  }
   0xf   :  { %87 = vmatpush.msra.mxu0 %v67_v1  ;;  %v284_v6 = vld [vmem:[%s491_s4] ss:$0 sm:$0xff]  ;;  %v285_v38 = vld [vmem:[%s491_s4 + $0x1] ss:$0 sm:$0xff]  ;;  %v286_v41 = vld [vmem:[%s491_s4 + $0x2] ss:$0 sm:$0xff] }
  0x10   :  { %152 = vmatpush.msra.mxu1 %v133_v20  ;;  %v131_v23 = vld [vmem:[#allocation2] sm:$0xff]  ;;  %v192_v52 = vld [vmem:[%s490_s3 + $0x18] sm:$0xff]  ;;  %v191_v53 = vld [vmem:[%s490_s3 + $0x10] sm:$0xff] }
  0x11   :  { %88 = vmatpush.msra.mxu0 %v66_v3  ;;  %v287_v45 = vld [vmem:[%s491_s4 + $0x3] ss:$0 sm:$0xff]  ;;  %209 = vmatpush.msra.mxu2 %v192_v52  ;;  %v190_v54 = vld [vmem:[%s490_s3 + $0x8] sm:$0xff] }
  0x12   :  { %153 = vmatpush.msra.mxu1 %v132_v22  ;;  %v189_v55 = vld [vmem:[%s490_s3] sm:$0xff] }
  0x13   :  { %89 = vmatpush.msra.mxu0 %v65_v4  ;;  %v294_v13 = vpop.eup %293  ;;  %210 = vmatpush.msra.mxu2 %v191_v53 }
  0x14   :  { %274 = vmatmul.msk.f32.vlgmr.msra.gmra.mxu0 %vm70_vm0, %v55_v5  ;;  %v98_v14 = vmul.f32 32.0, %v294_v13  ;;  %vm102_vm1 = vweird.f32 %v294_v13  ;;  %154 = vmatpush.msra.mxu1 %v131_v23 }
  0x15   :  { %211 = vmatpush.msra.mxu2 %v190_v54 }
  0x16   :  { %v99_v15 = vsub.f32 1.0, %v98_v14 }
  0x17   :  { %212 = vmatpush.msra.mxu2 %v189_v55 }
  0x18   :  { %v100_v16 = vmul.f32 %v294_v13, %v99_v15 }
  0x1a   :  { %v101_v17 = vadd.f32 %v294_v13, %v100_v16 }
  0x1c   :  { %v103_v21 = vsel %vm102_vm1, %v294_v13, %v101_v17  ;;  %v290_v13 = vld [vmem:[#allocation5] ss:$0 sm:$0xff] }
  0x91   :  { %v91_v7 = vpop.f32.mrf.mxu0 }
  0x92   :  { %v92_v8 = vadd.f32 %v284_v6, %v91_v7  ;;  %v288_v6 = vld [vmem:[%s491_s4 + $0x4] ss:$0 sm:$0xff] }
  0x94   :  { %v94_v9 = vsel %vm70_vm0, %v92_v8, 0.0  ;;  %v105_v10 = vmul.f32 %v92_v8, %v92_v8 }
  0x95   :  { %95 = vadd.xlane.f32.xlu0 %v94_v9  ;;  %v289_v9 = vld [vmem:[%s491_s4 + $0x5] ss:$0 sm:$0xff]  ;;  %s387_s4 = smov [#allocation7]  }
  0x96   :  { %v106_v11 = vsel %vm70_vm0, %v105_v10, 0.0  ;;  %s261_s9 = sshll.u32 %s387_s4, 4  ;;  %s262_s9 = int_to_ptr.vmem [resolvable:$true] %s261_s9 }
  0x9d   :  { %107 = vadd.xlane.f32.xlu0 %v106_v11 }
 0x108   :  { %v96_v18 = vpop.xlane.xlu0 %95 }
 0x109   :  { %v104_v24 = vmul.f32 %v103_v21, %v96_v18 }
 0x10b   :  { %v110_v26 = vmul.f32 %v104_v24, %v104_v24  ;;  %v113_v37 = vsub.f32 %v92_v8, %v104_v24 }
 0x110   :  { %v108_v25 = vpop.xlane.xlu0 %107 }
 0x111   :  { %v109_v27 = vmul.f32 %v108_v25, %v103_v21 }
 0x113   :  { %v111_v28 = vsub.f32 %v109_v27, %v110_v26 }
 0x115   :  { %v112_v29 = vmax.f32 %v111_v28, 0.0 }
 0x117   :  { %v114_v30 = vadd.f32 1e-05, %v112_v29 }
 0x119   :  { %295 = vrsqrt.f32 %v114_v30  ;;  %vm121_vm3 = vweird.f32 %v114_v30 }
 0x11f   :  { %v296_v31 = vpop.eup %295 }
 0x120   :  { %v116_v32 = vmul.f32 %v296_v31, %v114_v30  ;;  %vm122_vm2 = vweird.f32 %v296_v31 }
 0x121   :  { %vm123_vm4 = vmor %vm121_vm3, %vm122_vm2 }
 0x122   :  { %v117_v33 = vmul.f32 %v296_v31, %v116_v32 }
 0x124   :  { %v118_v34 = vmul.f32 0.5, %v117_v33 }
 0x126   :  { %v119_v35 = vsub.f32 1.5, %v118_v34 }
 0x128   :  { %v120_v36 = vmul.f32 %v296_v31, %v119_v35 }
 0x12a   :  { %v124_v39 = vsel %vm123_vm4, %v296_v31, %v120_v36 }
 0x12b   :  { %v125_v40 = vmul.f32 %v124_v39, %v113_v37 }
 0x12d   :  { %v127_v42 = vmul.f32 %v285_v38, %v125_v40 }
 0x12f   :  { %v129_v43 = vadd.f32 %v286_v41, %v127_v42  ;;  %v291_v41 = vld [vmem:[#allocation5 + $0x1] ss:$0 sm:$0xff] }
 0x131   :  { %v130_v44 = vmax.f32 %v129_v43, 0.0 }
 0x133   :  { %275 = vmatmul.msk.f32.vlgmr.msra.gmra.mxu1 %vm70_vm0, %v130_v44  ;;  %v292_v44 = vld [vmem:[#allocation5 + $0x2] ss:$0 sm:$0xff] }
 0x1b0   :  { %v156_v46 = vpop.f32.mrf.mxu1 }
 0x1b1   :  { %v157_v47 = vadd.f32 %v287_v45, %v156_v46 }
 0x1b3   :  { %v159_v48 = vsel %vm70_vm0, %v157_v47, 0.0  ;;  %v163_v49 = vmul.f32 %v157_v47, %v157_v47 }
 0x1b4   :  { %160 = vadd.xlane.f32.xlu1 %v159_v48 }
 0x1b5   :  { %v164_v50 = vsel %vm70_vm0, %v163_v49, 0.0 }
 0x1bc   :  { %165 = vadd.xlane.f32.xlu1 %v164_v50 }
 0x227   :  { %v161_v51 = vpop.xlane.xlu1 %160 }
 0x228   :  { %v162_v56 = vmul.f32 %v161_v51, %v103_v21 }
 0x22a   :  { %v168_v58 = vmul.f32 %v162_v56, %v162_v56  ;;  %v171_v5 = vsub.f32 %v157_v47, %v162_v56 }
 0x22f   :  { %v166_v57 = vpop.xlane.xlu1 %165 }
 0x230   :  { %v167_v59 = vmul.f32 %v166_v57, %v103_v21 }
 0x232   :  { %v169_v60 = vsub.f32 %v167_v59, %v168_v58 }
 0x234   :  { %v170_v61 = vmax.f32 %v169_v60, 0.0 }
 0x236   :  { %v172_v62 = vadd.f32 1e-05, %v170_v61 }
 0x238   :  { %297 = vrsqrt.f32 %v172_v62  ;;  %vm179_vm6 = vweird.f32 %v172_v62 }
 0x239   :  { %299 = vrcp.f32 %v386_v19 }
 0x23e   :  { %v298_v63 = vpop.eup %297 }
 0x23f   :  { %v174_v0 = vmul.f32 %v298_v63, %v172_v62  ;;  %vm180_vm5 = vweird.f32 %v298_v63  ;;  %v300_v20 = vpop.eup %299 }
 0x240   :  { %vm181_vm7 = vmor %vm179_vm6, %vm180_vm5  ;;  %v222_v21 = vmul.f32 16.0, %v300_v20  ;;  %vm226_vm9 = vweird.f32 %v300_v20 }
 0x241   :  { %v175_v1 = vmul.f32 %v298_v63, %v174_v0 }
 0x242   :  { %v223_v22 = vsub.f32 1.0, %v222_v21 }
 0x243   :  { %v176_v2 = vmul.f32 0.5, %v175_v1 }
 0x244   :  { %v224_v23 = vmul.f32 %v300_v20, %v223_v22 }
 0x245   :  { %v177_v3 = vsub.f32 1.5, %v176_v2 }
 0x246   :  { %v225_v24 = vadd.f32 %v300_v20, %v224_v23 }
 0x247   :  { %v178_v4 = vmul.f32 %v298_v63, %v177_v3 }
 0x248   :  { %v227_v26 = vsel %vm226_vm9, %v300_v20, %v225_v24 }
 0x249   :  { %v182_v7 = vsel %vm181_vm7, %v298_v63, %v178_v4 }
 0x24a   :  { %v183_v8 = vmul.f32 %v182_v7, %v171_v5 }
 0x24c   :  { %v185_v10 = vmul.f32 %v288_v6, %v183_v8 }
 0x24e   :  { %v187_v11 = vadd.f32 %v289_v9, %v185_v10 }
 0x250   :  { %v188_v12 = vmax.f32 %v187_v11, 0.0 }
 0x252   :  { %276 = vmatmul.msk.f32.vlgmr.msra.gmra.mxu2 %vm70_vm0, %v188_v12 }
 0x2d5   :  { %v214_v14 = vpop.f32.mrf.mxu2 }
 0x2d6   :  { %v215_v15 = vadd.f32 %v290_v13, %v214_v14 }
 0x2d8   :  { %v218_v16 = vsel %vm217_vm8, %v215_v15, 0.0  ;;  %v229_v17 = vmul.f32 %v215_v15, %v215_v15 }
 0x2d9   :  { %219 = vadd.xlane.f32.xlu2 %v218_v16 }
 0x2da   :  { %v230_v18 = vsel %vm217_vm8, %v229_v17, 0.0 }
 0x2e1   :  { %231 = vadd.xlane.f32.xlu2 %v230_v18 }
 0x34c   :  { %v220_v25 = vpop.xlane.xlu2 %219 }
 0x34d   :  { %v228_v27 = vmul.f32 %v227_v26, %v220_v25 }
 0x34f   :  { %v234_v29 = vmul.f32 %v228_v27, %v228_v27  ;;  %v237_v40 = vsub.f32 %v215_v15, %v228_v27 }
 0x354   :  { %v232_v28 = vpop.xlane.xlu2 %231 }
 0x355   :  { %v233_v30 = vmul.f32 %v232_v28, %v227_v26 }
 0x357   :  { %v235_v31 = vsub.f32 %v233_v30, %v234_v29 }
 0x359   :  { %v236_v32 = vmax.f32 %v235_v31, 0.0 }
 0x35b   :  { %v238_v33 = vadd.f32 1e-05, %v236_v32 }
 0x35d   :  { %301 = vrsqrt.f32 %v238_v33  ;;  %vm245_vm11 = vweird.f32 %v238_v33 }
 0x363   :  { %v302_v34 = vpop.eup %301 }
 0x364   :  { %v240_v35 = vmul.f32 %v302_v34, %v238_v33  ;;  %vm246_vm10 = vweird.f32 %v302_v34 }
 0x365   :  { %vm247_vm12 = vmor %vm245_vm11, %vm246_vm10 }
 0x366   :  { %v241_v36 = vmul.f32 %v302_v34, %v240_v35 }
 0x368   :  { %v242_v37 = vmul.f32 0.5, %v241_v36 }
 0x36a   :  { %v243_v38 = vsub.f32 1.5, %v242_v37 }
 0x36c   :  { %v244_v39 = vmul.f32 %v302_v34, %v243_v38 }
 0x36e   :  { %v248_v42 = vsel %vm247_vm12, %v302_v34, %v244_v39 }
 0x36f   :  { %v249_v43 = vmul.f32 %v248_v42, %v237_v40 }
 0x371   :  { %v251_v45 = vmul.f32 %v291_v41, %v249_v43 }
 0x373   :  { %v253_v46 = vadd.f32 %v292_v44, %v251_v45 }
 0x375   :  { %v254_v47 = vmax.f32 %v253_v46, 0.0 }
 0x377   :  { %255 = vst.msk [vmem:[#allocation7] sm:$0xff] %vm217_vm8, %v254_v47 }
 0x378   :  { %266 = dma.vmem_to_hbm [thread:$0]  %s262_s9, 128, %s264_s5, [#allocation4]  }
 0x379   :  { %379 = dma.done.wait [#allocation4], 128  }
 0x37a   :  { %380 = vsyncadd [#allocation4], 4294967168 }
 0x37b   :  { %271 = vsyncpa [#allocation3], 1 }
 0x37c   :  { %272 = vsyncpa [#allocation6], 1 }
 0x37d   :  { %273 = vsyncpa [#allocation4], 1 }

// kernel: _mlp_forward_impl.1
= control target key start
LH: loop header
LB: loop body
LE: loop exit
PB: predicated region body
PF: predicated region fallthrough
CT: control target
= control target key end

     0   :  { %11 = vsyncpa [#allocation3], 0  ;;  %s487_s0 = inlined_call_operand.vmem [shape: f32[8,32], index: 0, kind: input, shape index: {}]   ;;  %s488_s1 = inlined_call_operand.vmem [shape: f32[32,32], index: 1, kind: input, shape index: {}]   ;;  %s489_s2 = inlined_call_operand.hbm [shape: f32[32,32], index: 2, kind: input, shape index: {}]   ;;  %s490_s3 = inlined_call_operand.vmem [shape: f32[32,16], index: 3, kind: input, shape index: {}]   ;;  %s491_s4 = inlined_call_operand.vmem [shape: f32[6,32], index: 4, kind: input, shape index: {}]   ;;  %s492_s5 = inlined_call_operand.hbm [shape: f32[3,16], index: 5, kind: input, shape index: {}]   ;;  %s493_s6 = inlined_call_operand.hbm [shape: f32[8,16], index: 6, kind: output, shape index: {}]  }
   0x1   :  { %12 = vsyncpa [#allocation6], 0 }
   0x2   :  { %13 = vsyncpa [#allocation4], 0  ;;  %s22_s23 = sshll.u32 %s489_s2, 4  ;;  %s381_s24 = smov [#allocation2]   ;;  %s23_s23 = int_to_ptr.hbm [resolvable:$true] %s22_s23 }
   0x3   :  { %s24_s25 = sshll.u32 %s381_s24, 4  ;;  %s40_s28 = sshll.u32 %s492_s5, 4  ;;  %s25_s25 = int_to_ptr.vmem [resolvable:$true] %s24_s25  ;;  %s41_s28 = int_to_ptr.hbm [resolvable:$true] %s40_s28 }
   0x4   :  { %s382_s29 = smov 128   ;;  %s383_s30 = smov 8  }
   0x5   :  { %30 = dma.hbm_to_vmem [thread:$0]  %s23_s23, 512, %s25_s25, [#allocation3], %s382_s29, %s382_s29, %s383_s30  }
   0x6   :  { %s384_s7 = smov [#allocation5]  }
   0x7   :  { %s42_s8 = sshll.u32 %s384_s7, 4  ;;  %s43_s8 = int_to_ptr.vmem [resolvable:$true] %s42_s8 }
   0x8   :  { %45 = dma.hbm_to_vmem [thread:$0]  %s41_s28, 64, %s43_s8, [#allocation6]  }
   0x9   :  { %375 = dma.done.wait [#allocation3], 512  }
   0xa   :  { %376 = vsyncadd [#allocation3], 4294966784 }
   0xb   :  { %377 = dma.done.wait [#allocation6], 64  }
   0xc   :  { %378 = vsyncadd [#allocation6], 4294967232  ;;  %v68_v0 = vld [vmem:[%s488_s1 + $0x18] sm:$0xff]  ;;  %v67_v1 = vld [vmem:[%s488_s1 + $0x10] sm:$0xff]  ;;  %vm70_vm0 = vcmask 261120   ;;  %v385_v12 = vmov 32.0  }
   0xd   :  { %86 = vmatpush.msra.mxu0 %v68_v0  ;;  %v54_v2 = vld [vmem:[%s487_s0] sm:$0xff]  ;;  %v66_v3 = vld [vmem:[%s488_s1 + $0x8] sm:$0xff]  ;;  %293 = vrcp.f32 %v385_v12  ;;  %v134_v19 = vld [vmem:[#allocation2 + $0x18] sm:$0xff]  ;;  %vm217_vm8 = vcmask 130048   ;;  %s263_s5 = sshll.u32 %s493_s6, 4  ;;  %s264_s5 = int_to_ptr.hbm [resolvable:$true] %s263_s5 }
   0xe   :  { %v65_v4 = vld [vmem:[%s488_s1] sm:$0xff]  ;;  %v55_v5 = vand.u32 2147483647, %v54_v2  ;;  %v133_v20 = vld [vmem:[#allocation2 + $0x10] sm:$0xff]  ;;  %151 = vmatpush.msra.mxu1 %v134_v19  ;;  %v132_v22 = vld [vmem:[#allocation2 + $0x8] sm:$0xff]  ;;  %v386_v19 = vmov 16.0  }
   0xf   :  { %87 = vmatpush.msra.mxu0 %v67_v1  ;;  %v284_v6 = vld [vmem:[%s491_s4] ss:$0 sm:$0xff]  ;;  %v285_v38 = vld [vmem:[%s491_s4 + $0x1] ss:$0 sm:$0xff]  ;;  %v286_v41 = vld [vmem:[%s491_s4 + $0x2] ss:$0 sm:$0xff] }
  0x10   :  { %152 = vmatpush.msra.mxu1 %v133_v20  ;;  %v131_v23 = vld [vmem:[#allocation2] sm:$0xff]  ;;  %v192_v52 = vld [vmem:[%s490_s3 + $0x18] sm:$0xff]  ;;  %v191_v53 = vld [vmem:[%s490_s3 + $0x10] sm:$0xff] }
  0x11   :  { %88 = vmatpush.msra.mxu0 %v66_v3  ;;  %v287_v45 = vld [vmem:[%s491_s4 + $0x3] ss:$0 sm:$0xff]  ;;  %209 = vmatpush.msra.mxu2 %v192_v52  ;;  %v190_v54 = vld [vmem:[%s490_s3 + $0x8] sm:$0xff] }
  0x12   :  { %153 = vmatpush.msra.mxu1 %v132_v22  ;;  %v189_v55 = vld [vmem:[%s490_s3] sm:$0xff] }
  0x13   :  { %89 = vmatpush.msra.mxu0 %v65_v4  ;;  %v294_v13 = vpop.eup %293  ;;  %210 = vmatpush.msra.mxu2 %v191_v53 }
  0x14   :  { %274 = vmatmul.msk.f32.vlgmr.msra.gmra.mxu0 %vm70_vm0, %v55_v5  ;;  %v98_v14 = vmul.f32 32.0, %v294_v13  ;;  %vm102_vm1 = vweird.f32 %v294_v13  ;;  %154 = vmatpush.msra.mxu1 %v131_v23 }
  0x15   :  { %211 = vmatpush.msra.mxu2 %v190_v54 }
  0x16   :  { %v99_v15 = vsub.f32 1.0, %v98_v14 }
  0x17   :  { %212 = vmatpush.msra.mxu2 %v189_v55 }
  0x18   :  { %v100_v16 = vmul.f32 %v294_v13, %v99_v15 }
  0x1a   :  { %v101_v17 = vadd.f32 %v294_v13, %v100_v16 }
  0x1c   :  { %v103_v21 = vsel %vm102_vm1, %v294_v13, %v101_v17  ;;  %v290_v13 = vld [vmem:[#allocation5] ss:$0 sm:$0xff] }
  0x91   :  { %v91_v7 = vpop.f32.mrf.mxu0 }
  0x92   :  { %v92_v8 = vadd.f32 %v284_v6, %v91_v7  ;;  %v288_v6 = vld [vmem:[%s491_s4 + $0x4] ss:$0 sm:$0xff] }
  0x94   :  { %v94_v9 = vsel %vm70_vm0, %v92_v8, 0.0  ;;  %v105_v10 = vmul.f32 %v92_v8, %v92_v8 }
  0x95   :  { %95 = vadd.xlane.f32.xlu0 %v94_v9  ;;  %v289_v9 = vld [vmem:[%s491_s4 + $0x5] ss:$0 sm:$0xff]  ;;  %s387_s4 = smov [#allocation7]  }
  0x96   :  { %v106_v11 = vsel %vm70_vm0, %v105_v10, 0.0  ;;  %s261_s9 = sshll.u32 %s387_s4, 4  ;;  %s262_s9 = int_to_ptr.vmem [resolvable:$true] %s261_s9 }
  0x9d   :  { %107 = vadd.xlane.f32.xlu0 %v106_v11 }
 0x108   :  { %v96_v18 = vpop.xlane.xlu0 %95 }
 0x109   :  { %v104_v24 = vmul.f32 %v103_v21, %v96_v18 }
 0x10b   :  { %v110_v26 = vmul.f32 %v104_v24, %v104_v24  ;;  %v113_v37 = vsub.f32 %v92_v8, %v104_v24 }
 0x110   :  { %v108_v25 = vpop.xlane.xlu0 %107 }
 0x111   :  { %v109_v27 = vmul.f32 %v108_v25, %v103_v21 }
 0x113   :  { %v111_v28 = vsub.f32 %v109_v27, %v110_v26 }
 0x115   :  { %v112_v29 = vmax.f32 %v111_v28, 0.0 }
 0x117   :  { %v114_v30 = vadd.f32 1e-05, %v112_v29 }
 0x119   :  { %295 = vrsqrt.f32 %v114_v30  ;;  %vm121_vm3 = vweird.f32 %v114_v30 }
 0x11f   :  { %v296_v31 = vpop.eup %295 }
 0x120   :  { %v116_v32 = vmul.f32 %v296_v31, %v114_v30  ;;  %vm122_vm2 = vweird.f32 %v296_v31 }
 0x121   :  { %vm123_vm4 = vmor %vm121_vm3, %vm122_vm2 }
 0x122   :  { %v117_v33 = vmul.f32 %v296_v31, %v116_v32 }
 0x124   :  { %v118_v34 = vmul.f32 0.5, %v117_v33 }
 0x126   :  { %v119_v35 = vsub.f32 1.5, %v118_v34 }
 0x128   :  { %v120_v36 = vmul.f32 %v296_v31, %v119_v35 }
 0x12a   :  { %v124_v39 = vsel %vm123_vm4, %v296_v31, %v120_v36 }
 0x12b   :  { %v125_v40 = vmul.f32 %v124_v39, %v113_v37 }
 0x12d   :  { %v127_v42 = vmul.f32 %v285_v38, %v125_v40 }
 0x12f   :  { %v129_v43 = vadd.f32 %v286_v41, %v127_v42  ;;  %v291_v41 = vld [vmem:[#allocation5 + $0x1] ss:$0 sm:$0xff] }
 0x131   :  { %v130_v44 = vmax.f32 %v129_v43, 0.0 }
 0x133   :  { %275 = vmatmul.msk.f32.vlgmr.msra.gmra.mxu1 %vm70_vm0, %v130_v44  ;;  %v292_v44 = vld [vmem:[#allocation5 + $0x2] ss:$0 sm:$0xff] }
 0x1b0   :  { %v156_v46 = vpop.f32.mrf.mxu1 }
 0x1b1   :  { %v157_v47 = vadd.f32 %v287_v45, %v156_v46 }
 0x1b3   :  { %v159_v48 = vsel %vm70_vm0, %v157_v47, 0.0  ;;  %v163_v49 = vmul.f32 %v157_v47, %v157_v47 }
 0x1b4   :  { %160 = vadd.xlane.f32.xlu1 %v159_v48 }
 0x1b5   :  { %v164_v50 = vsel %vm70_vm0, %v163_v49, 0.0 }
 0x1bc   :  { %165 = vadd.xlane.f32.xlu1 %v164_v50 }
 0x227   :  { %v161_v51 = vpop.xlane.xlu1 %160 }
 0x228   :  { %v162_v56 = vmul.f32 %v161_v51, %v103_v21 }
 0x22a   :  { %v168_v58 = vmul.f32 %v162_v56, %v162_v56  ;;  %v171_v5 = vsub.f32 %v157_v47, %v162_v56 }
 0x22f   :  { %v166_v57 = vpop.xlane.xlu1 %165 }
 0x230   :  { %v167_v59 = vmul.f32 %v166_v57, %v103_v21 }
 0x232   :  { %v169_v60 = vsub.f32 %v167_v59, %v168_v58 }
 0x234   :  { %v170_v61 = vmax.f32 %v169_v60, 0.0 }
 0x236   :  { %v172_v62 = vadd.f32 1e-05, %v170_v61 }
 0x238   :  { %297 = vrsqrt.f32 %v172_v62  ;;  %vm179_vm6 = vweird.f32 %v172_v62 }
 0x239   :  { %299 = vrcp.f32 %v386_v19 }
 0x23e   :  { %v298_v63 = vpop.eup %297 }
 0x23f   :  { %v174_v0 = vmul.f32 %v298_v63, %v172_v62  ;;  %vm180_vm5 = vweird.f32 %v298_v63  ;;  %v300_v20 = vpop.eup %299 }
 0x240   :  { %vm181_vm7 = vmor %vm179_vm6, %vm180_vm5  ;;  %v222_v21 = vmul.f32 16.0, %v300_v20  ;;  %vm226_vm9 = vweird.f32 %v300_v20 }
 0x241   :  { %v175_v1 = vmul.f32 %v298_v63, %v174_v0 }
 0x242   :  { %v223_v22 = vsub.f32 1.0, %v222_v21 }
 0x243   :  { %v176_v2 = vmul.f32 0.5, %v175_v1 }
 0x244   :  { %v224_v23 = vmul.f32 %v300_v20, %v223_v22 }
 0x245   :  { %v177_v3 = vsub.f32 1.5, %v176_v2 }
 0x246   :  { %v225_v24 = vadd.f32 %v300_v20, %v224_v23 }
 0x247   :  { %v178_v4 = vmul.f32 %v298_v63, %v177_v3 }
 0x248   :  { %v227_v26 = vsel %vm226_vm9, %v300_v20, %v225_v24 }
 0x249   :  { %v182_v7 = vsel %vm181_vm7, %v298_v63, %v178_v4 }
 0x24a   :  { %v183_v8 = vmul.f32 %v182_v7, %v171_v5 }
 0x24c   :  { %v185_v10 = vmul.f32 %v288_v6, %v183_v8 }
 0x24e   :  { %v187_v11 = vadd.f32 %v289_v9, %v185_v10 }
 0x250   :  { %v188_v12 = vmax.f32 %v187_v11, 0.0 }
 0x252   :  { %276 = vmatmul.msk.f32.vlgmr.msra.gmra.mxu2 %vm70_vm0, %v188_v12 }
 0x2d5   :  { %v214_v14 = vpop.f32.mrf.mxu2 }
 0x2d6   :  { %v215_v15 = vadd.f32 %v290_v13, %v214_v14 }
 0x2d8   :  { %v218_v16 = vsel %vm217_vm8, %v215_v15, 0.0  ;;  %v229_v17 = vmul.f32 %v215_v15, %v215_v15 }
 0x2d9   :  { %219 = vadd.xlane.f32.xlu2 %v218_v16 }
 0x2da   :  { %v230_v18 = vsel %vm217_vm8, %v229_v17, 0.0 }
 0x2e1   :  { %231 = vadd.xlane.f32.xlu2 %v230_v18 }
 0x34c   :  { %v220_v25 = vpop.xlane.xlu2 %219 }
 0x34d   :  { %v228_v27 = vmul.f32 %v227_v26, %v220_v25 }
 0x34f   :  { %v234_v29 = vmul.f32 %v228_v27, %v228_v27  ;;  %v237_v40 = vsub.f32 %v215_v15, %v228_v27 }
 0x354   :  { %v232_v28 = vpop.xlane.xlu2 %231 }
 0x355   :  { %v233_v30 = vmul.f32 %v232_v28, %v227_v26 }
 0x357   :  { %v235_v31 = vsub.f32 %v233_v30, %v234_v29 }
 0x359   :  { %v236_v32 = vmax.f32 %v235_v31, 0.0 }
 0x35b   :  { %v238_v33 = vadd.f32 1e-05, %v236_v32 }
 0x35d   :  { %301 = vrsqrt.f32 %v238_v33  ;;  %vm245_vm11 = vweird.f32 %v238_v33 }
 0x363   :  { %v302_v34 = vpop.eup %301 }
 0x364   :  { %v240_v35 = vmul.f32 %v302_v34, %v238_v33  ;;  %vm246_vm10 = vweird.f32 %v302_v34 }
 0x365   :  { %vm247_vm12 = vmor %vm245_vm11, %vm246_vm10 }
 0x366   :  { %v241_v36 = vmul.f32 %v302_v34, %v240_v35 }
 0x368   :  { %v242_v37 = vmul.f32 0.5, %v241_v36 }
 0x36a   :  { %v243_v38 = vsub.f32 1.5, %v242_v37 }
 0x36c   :  { %v244_v39 = vmul.f32 %v302_v34, %v243_v38 }
 0x36e   :  { %v248_v42 = vsel %vm247_vm12, %v302_v34, %v244_v39 }
 0x36f   :  { %v249_v43 = vmul.f32 %v248_v42, %v237_v40 }
 0x371   :  { %v251_v45 = vmul.f32 %v291_v41, %v249_v43 }
 0x373   :  { %v253_v46 = vadd.f32 %v292_v44, %v251_v45 }
 0x375   :  { %v254_v47 = vmax.f32 %v253_v46, 0.0 }
 0x377   :  { %255 = vst.msk [vmem:[#allocation7] sm:$0xff] %vm217_vm8, %v254_v47 }
 0x378   :  { %266 = dma.vmem_to_hbm [thread:$0]  %s262_s9, 128, %s264_s5, [#allocation4]  }
 0x379   :  { %379 = dma.done.wait [#allocation4], 128  }
 0x37a   :  { %380 = vsyncadd [#allocation4], 4294967168 }
 0x37b   :  { %271 = vsyncpa [#allocation3], 1 }
 0x37c   :  { %272 = vsyncpa [#allocation6], 1 }
 0x37d   :  { %273 = vsyncpa [#allocation4], 1 }

</bundles_post_ra>
